<compile_context>
chip_gen: v5e
topology: v5e:2x2
jax: 0.10.0
libtpu: 0.0.40
codegen_flags: <defaults>
</compile_context>

<pallas_src>
import functools

import jax
import jax.numpy as jnp
from jax.experimental import pallas as pl
from jax.experimental.pallas import tpu as pltpu


LANE = 128       # lane-dense last dim (f32 vreg lane count)
SUBLANE = 8      # f32 sublane granularity
TM_TARGET = 512  # batch-tile rows; largest measured sweet spot for pipelining


def _round_up(n, m):
    return (n + m - 1) // m * m


# ---------------- fused Pallas kernel (one batch tile) ----------------

def _fused_mlp_kernel(x_ref, *refs, num_layers, negative_slope, valid_out):
    """x_ref: (TM, din_p) activation tile; refs = (w1, b1, ..., wn, bn, o_ref).

    Weights are already (Din_pad, Dout_pad) (pre-transposed, zero-padded),
    biases are (1, Dout_pad).  Inter-layer activations never leave VMEM/vregs.
    """
    o_ref = refs[-1]
    wb = refs[:-1]

    h = x_ref[...]
    # Hidden layers: matmul + bias + LeakyReLU (single vmax per element).
    for i in range(num_layers - 1):
        w = wb[2 * i][...]
        b = wb[2 * i + 1][...]
        y = jnp.dot(h, w, preferred_element_type=jnp.float32) + b
        h = jnp.maximum(y, negative_slope * y)   # valid for 0 <= slope <= 1

    # Final layer: matmul + bias, then masked softmax over the last dim.
    w = wb[-2][...]
    b = wb[-1][...]
    y = jnp.dot(h, w, preferred_element_type=jnp.float32) + b

    # Mask padded output lanes so they contribute exactly 0 to the softmax.
    lane = jax.lax.broadcasted_iota(jnp.int32, y.shape, 1)
    y = jnp.where(lane < valid_out, y, jnp.float32(-1e30))

    m = jnp.max(y, axis=-1, keepdims=True)
    e = jnp.exp(y - m)
    s = jnp.sum(e, axis=-1, keepdims=True)
    inv = 1.0 / s                                # one exact divide per row ...
    o_ref[...] = (e * inv).astype(o_ref.dtype)   # ... then a cheap vmul


# ---------------- layout plumbing (done once) ----------------

def prepare_padded_params(params):
    """Transpose torch-layout (Dout, Din) weights to (Din, Dout) and zero-pad
    every feature dim up to a multiple of 128 (lane-dense)."""
    padded = []
    for w, b in params:
        dout, din = w.shape
        din_p = _round_up(din, LANE)
        dout_p = _round_up(dout, LANE)
        w_t = jnp.zeros((din_p, dout_p), jnp.float32).at[:din, :dout].set(w.T)
        b_p = jnp.zeros((1, dout_p), jnp.float32).at[:, :dout].set(b.reshape(1, -1))
        padded.append((w_t, b_p))
    return padded


def _estimate_vmem_limit_bytes(tm, din_p, padded_params):
    """Resident footprint: pipelined x/out tiles (x2) + all weights/biases
    (conservatively x2) + a few activation-sized temporaries, then clamped to
    [32 MiB default, 64 MiB v7x physical] so it is valid on every chip."""
    f32 = 4
    dout_p = padded_params[-1][0].shape[1]
    total = 2 * tm * din_p * f32
    total += 2 * tm * dout_p * f32
    widest = din_p
    for w, b in padded_params:
        total += 2 * (int(w.size) + int(b.size)) * f32
        widest = max(widest, w.shape[1])
    total += 4 * tm * widest * f32
    return int(min(max(2 * total, 32 << 20), 64 << 20))


# ---------------- wrapper ----------------

def fused_mlp_forward(padded_params, x, output_dim, negative_slope=0.2):
    """x: (B, input_dim) f32. Returns softmax probs (B, output_dim)."""
    assert 0.0 <= negative_slope <= 1.0, "LeakyReLU-as-max requires slope in [0, 1]"
    num_layers = len(padded_params)
    B, din = x.shape
    din_p = padded_params[0][0].shape[0]
    dout_p = padded_params[-1][0].shape[1]

    # Batch tile: up to TM_TARGET rows, sublane-aligned; pad batch to a multiple.
    tm = TM_TARGET if B >= TM_TARGET else _round_up(B, SUBLANE)
    Bp = _round_up(B, tm)
    n_tiles = Bp // tm

    x_p = jnp.zeros((Bp, din_p), jnp.float32).at[:B, :din].set(x)

    flat_inputs = [x_p]
    in_specs = [pl.BlockSpec((tm, din_p), lambda i: (i, 0))]
    for w, b in padded_params:
        flat_inputs += [w, b]
        # Constant block index -> weights stay resident; no re-DMA across tiles.
        in_specs.append(pl.BlockSpec(w.shape, lambda i: (0, 0)))
        in_specs.append(pl.BlockSpec(b.shape, lambda i: (0, 0)))
    # TODO(synk): single-buffer the constant weight/bias specs with
    # pipeline_mode=pl.Buffered(1) once validated on the deployed jax version
    # (halves resident weight VMEM; matters most on v7x's 64 MiB).

    out_p = pl.pallas_call(
        functools.partial(
            _fused_mlp_kernel,
            num_layers=num_layers,
            negative_slope=negative_slope,
            valid_out=output_dim,
        ),
        out_shape=jax.ShapeDtypeStruct((Bp, dout_p), jnp.float32),
        grid=(n_tiles,),
        in_specs=in_specs,
        out_specs=pl.BlockSpec((tm, dout_p), lambda i: (i, 0)),
        compiler_params=pltpu.CompilerParams(
            dimension_semantics=("parallel",),
            vmem_limit_bytes=_estimate_vmem_limit_bytes(tm, din_p, padded_params),
        ),
    )(*flat_inputs)

    return out_p[:B, :output_dim]


# TODO(synk): for hidden dims beyond ~1-2K (v7x 64 MiB VMEM), switch the
# resident-weight design to a K/N-tiled grid with a trailing 'arbitrary' K
# axis and an f32 VMEM accumulator (and optionally bf16 weights on v6e/v7x).


# ---------------- init (mirrors torch.nn.Linear default) ----------------

def init_linear_model_params(key, input_dim, hidden_dims, output_dim):
    all_dims = [input_dim, *hidden_dims, output_dim]
    params = []
    for in_dim, out_dim in zip(all_dims[:-1], all_dims[1:]):
        key, kw, kb = jax.random.split(key, 3)
        bound = 1.0 / (in_dim ** 0.5)
        w = jax.random.uniform(kw, (out_dim, in_dim), jnp.float32, -bound, bound)
        b = jax.random.uniform(kb, (out_dim,), jnp.float32, -bound, bound)
        params.append((w, b))
    return params


# ---------------- pure-JAX reference ----------------

def _ref_forward(params, x, negative_slope=0.2):
    for w, b in params[:-1]:
        y = x @ w.T + b
        x = jnp.where(y >= 0, y, negative_slope * y)
    w, b = params[-1]
    y = x @ w.T + b
    return jax.nn.softmax(y, axis=-1)


if __name__ == "__main__":
    hyperparameters = {
        "input_dim": 32,
        "hidden_dims": [64, 64],
        "output_dim": 16,
        "negative_slope": 0.2,
    }

    key = jax.random.PRNGKey(0)
    key, kx = jax.random.split(key)
    batch = 8
    x = jax.random.normal(kx, (batch, hyperparameters["input_dim"]), jnp.float32)

    params = init_linear_model_params(
        key,
        hyperparameters["input_dim"],
        hyperparameters["hidden_dims"],
        hyperparameters["output_dim"],
    )

    # One-time layout plumbing: transpose + lane-pad weights/biases.
    padded_params = prepare_padded_params(params)

    fwd = jax.jit(
        functools.partial(
            fused_mlp_forward,
            output_dim=hyperparameters["output_dim"],
            negative_slope=hyperparameters["negative_slope"],
        )
    )

    out = jax.block_until_ready(fwd(padded_params, x))

    ref = _ref_forward(params, x, hyperparameters["negative_slope"])
    assert out.shape == (batch, hyperparameters["output_dim"])
    assert jnp.allclose(out, ref, atol=1e-5, rtol=1e-5), "mismatch vs reference"
    assert jnp.allclose(jnp.sum(out, axis=-1), 1.0, atol=1e-5), "softmax rows must sum to 1"

    print("KERNEL_OK")
</pallas_src>

<mosaic_0001>
module attributes {stable_mosaic.version = 11 : i64} {
  func.func @_fused_mlp_kernel(%arg0: i32, %arg1: memref<8x128xf32, #tpu.memory_space<vmem>>, %arg2: memref<128x128xf32, #tpu.memory_space<vmem>>, %arg3: memref<1x128xf32, #tpu.memory_space<vmem>>, %arg4: memref<128x128xf32, #tpu.memory_space<vmem>>, %arg5: memref<1x128xf32, #tpu.memory_space<vmem>>, %arg6: memref<128x128xf32, #tpu.memory_space<vmem>>, %arg7: memref<1x128xf32, #tpu.memory_space<vmem>>, %arg8: memref<8x128xf32, #tpu.memory_space<vmem>>) attributes {dimension_semantics = [#tpu.dimension_semantics<parallel>], iteration_bounds = array<i64: 1>, scalar_prefetch = 0 : i64, scratch_operands = 0 : i64, tpu.core_type = #tpu.core_type<tc>, window_params = [{transform_indices = @transform_0, window_bounds = array<i64: 8, 128>}, {pipeline_mode = #tpu.pipeline_mode<synchronous>, transform_indices = @transform_1, window_bounds = array<i64: 128, 128>}, {pipeline_mode = #tpu.pipeline_mode<synchronous>, transform_indices = @transform_2, window_bounds = array<i64: 1, 128>}, {pipeline_mode = #tpu.pipeline_mode<synchronous>, transform_indices = @transform_3, window_bounds = array<i64: 128, 128>}, {pipeline_mode = #tpu.pipeline_mode<synchronous>, transform_indices = @transform_4, window_bounds = array<i64: 1, 128>}, {pipeline_mode = #tpu.pipeline_mode<synchronous>, transform_indices = @transform_5, window_bounds = array<i64: 128, 128>}, {pipeline_mode = #tpu.pipeline_mode<synchronous>, transform_indices = @transform_6, window_bounds = array<i64: 1, 128>}, {transform_indices = @transform_7, window_bounds = array<i64: 8, 128>}]} {
    %c0 = arith.constant 0 : index
    %c0_0 = arith.constant 0 : index
    %0 = vector.load %arg1[%c0, %c0_0] : memref<8x128xf32, #tpu.memory_space<vmem>>, vector<8x128xf32>
    %c0_1 = arith.constant 0 : index
    %c0_2 = arith.constant 0 : index
    %1 = vector.load %arg2[%c0_1, %c0_2] : memref<128x128xf32, #tpu.memory_space<vmem>>, vector<128x128xf32>
    %c0_3 = arith.constant 0 : index
    %c0_4 = arith.constant 0 : index
    %2 = vector.load %arg3[%c0_3, %c0_4] : memref<1x128xf32, #tpu.memory_space<vmem>>, vector<1x128xf32>
    %cst = arith.constant dense<0.000000e+00> : vector<8x128xf32>
    %3 = tpu.matmul %0, %1, %cst {dimension_numbers = #tpu.dot_dimension_numbers<[1], [0], [0], [1], [0, 0, 1, 1], [], []>} : vector<8x128xf32>, vector<128x128xf32>, vector<8x128xf32> -> vector<8x128xf32>
    %4 = vector.broadcast %2 : vector<1x128xf32> to vector<8x128xf32>
    %5 = arith.addf %3, %4 : vector<8x128xf32>
    %cst_5 = arith.constant 2.000000e-01 : f32
    %6 = vector.broadcast %cst_5 : f32 to vector<8x128xf32>
    %7 = arith.mulf %6, %5 : vector<8x128xf32>
    %8 = arith.maximumf %5, %7 : vector<8x128xf32>
    %c0_6 = arith.constant 0 : index
    %c0_7 = arith.constant 0 : index
    %9 = vector.load %arg4[%c0_6, %c0_7] : memref<128x128xf32, #tpu.memory_space<vmem>>, vector<128x128xf32>
    %c0_8 = arith.constant 0 : index
    %c0_9 = arith.constant 0 : index
    %10 = vector.load %arg5[%c0_8, %c0_9] : memref<1x128xf32, #tpu.memory_space<vmem>>, vector<1x128xf32>
    %cst_10 = arith.constant dense<0.000000e+00> : vector<8x128xf32>
    %11 = tpu.matmul %8, %9, %cst_10 {dimension_numbers = #tpu.dot_dimension_numbers<[1], [0], [0], [1], [0, 0, 1, 1], [], []>} : vector<8x128xf32>, vector<128x128xf32>, vector<8x128xf32> -> vector<8x128xf32>
    %12 = vector.broadcast %10 : vector<1x128xf32> to vector<8x128xf32>
    %13 = arith.addf %11, %12 : vector<8x128xf32>
    %cst_11 = arith.constant 2.000000e-01 : f32
    %14 = vector.broadcast %cst_11 : f32 to vector<8x128xf32>
    %15 = arith.mulf %14, %13 : vector<8x128xf32>
    %16 = arith.maximumf %13, %15 : vector<8x128xf32>
    %c0_12 = arith.constant 0 : index
    %c0_13 = arith.constant 0 : index
    %17 = vector.load %arg6[%c0_12, %c0_13] : memref<128x128xf32, #tpu.memory_space<vmem>>, vector<128x128xf32>
    %c0_14 = arith.constant 0 : index
    %c0_15 = arith.constant 0 : index
    %18 = vector.load %arg7[%c0_14, %c0_15] : memref<1x128xf32, #tpu.memory_space<vmem>>, vector<1x128xf32>
    %cst_16 = arith.constant dense<0.000000e+00> : vector<8x128xf32>
    %19 = tpu.matmul %16, %17, %cst_16 {dimension_numbers = #tpu.dot_dimension_numbers<[1], [0], [0], [1], [0, 0, 1, 1], [], []>} : vector<8x128xf32>, vector<128x128xf32>, vector<8x128xf32> -> vector<8x128xf32>
    %20 = vector.broadcast %18 : vector<1x128xf32> to vector<8x128xf32>
    %21 = arith.addf %19, %20 : vector<8x128xf32>
    %22 = tpu.iota {dimensions = array<i32: 1>} : vector<8x128xi32>
    %c16_i32 = arith.constant 16 : i32
    %23 = vector.broadcast %c16_i32 : i32 to vector<8x128xi32>
    %24 = arith.cmpi slt, %22, %23 : vector<8x128xi32>
    %cst_17 = arith.constant -1.000000e+30 : f32
    %25 = vector.broadcast %cst_17 : f32 to vector<8x128xf32>
    %26 = arith.select %24, %21, %25 : vector<8x128xi1>, vector<8x128xf32>
    %cst_18 = arith.constant dense<0xFF800000> : vector<8xf32>
    %27 = vector.multi_reduction <maximumf>, %26, %cst_18 [1] : vector<8x128xf32> to vector<8xf32>
    %28 = vector.shape_cast %27 : vector<8xf32> to vector<8x1xf32>
    %29 = vector.broadcast %28 : vector<8x1xf32> to vector<8x128xf32>
    %30 = arith.subf %26, %29 : vector<8x128xf32>
    %31 = math.exp %30 : vector<8x128xf32>
    %cst_19 = arith.constant dense<0.000000e+00> : vector<8xf32>
    %32 = vector.multi_reduction <add>, %31, %cst_19 [1] : vector<8x128xf32> to vector<8xf32>
    %33 = vector.shape_cast %32 : vector<8xf32> to vector<8x1xf32>
    %cst_20 = arith.constant 1.000000e+00 : f32
    %34 = vector.broadcast %cst_20 : f32 to vector<8x1xf32>
    %35 = arith.divf %34, %33 : vector<8x1xf32>
    %36 = vector.broadcast %35 : vector<8x1xf32> to vector<8x128xf32>
    %37 = arith.mulf %31, %36 : vector<8x128xf32>
    %c0_21 = arith.constant 0 : index
    %c0_22 = arith.constant 0 : index
    %38 = vector.load %arg8[%c0_21, %c0_22] : memref<8x128xf32, #tpu.memory_space<vmem>>, vector<8x128xf32>
    tpu.vector_store %arg8[%c0_21, %c0_22], %37 {strides = array<i32>} : memref<8x128xf32, #tpu.memory_space<vmem>>, vector<8x128xf32>,
    return
  }
  func.func @transform_0(%arg0: i32) -> (i32, i32) {
    %c0_i32 = arith.constant 0 : i32
    %c0_i32_0 = arith.constant 0 : i32
    return %arg0, %c0_i32 : i32, i32
  }
  func.func @transform_1(%arg0: i32) -> (i32, i32) {
    %c0_i32 = arith.constant 0 : i32
    %c0_i32_0 = arith.constant 0 : i32
    %c0_i32_1 = arith.constant 0 : i32
    return %c0_i32, %c0_i32_0 : i32, i32
  }
  func.func @transform_2(%arg0: i32) -> (i32, i32) {
    %c0_i32 = arith.constant 0 : i32
    %c0_i32_0 = arith.constant 0 : i32
    %c0_i32_1 = arith.constant 0 : i32
    return %c0_i32, %c0_i32_0 : i32, i32
  }
  func.func @transform_3(%arg0: i32) -> (i32, i32) {
    %c0_i32 = arith.constant 0 : i32
    %c0_i32_0 = arith.constant 0 : i32
    %c0_i32_1 = arith.constant 0 : i32
    return %c0_i32, %c0_i32_0 : i32, i32
  }
  func.func @transform_4(%arg0: i32) -> (i32, i32) {
    %c0_i32 = arith.constant 0 : i32
    %c0_i32_0 = arith.constant 0 : i32
    %c0_i32_1 = arith.constant 0 : i32
    return %c0_i32, %c0_i32_0 : i32, i32
  }
  func.func @transform_5(%arg0: i32) -> (i32, i32) {
    %c0_i32 = arith.constant 0 : i32
    %c0_i32_0 = arith.constant 0 : i32
    %c0_i32_1 = arith.constant 0 : i32
    return %c0_i32, %c0_i32_0 : i32, i32
  }
  func.func @transform_6(%arg0: i32) -> (i32, i32) {
    %c0_i32 = arith.constant 0 : i32
    %c0_i32_0 = arith.constant 0 : i32
    %c0_i32_1 = arith.constant 0 : i32
    return %c0_i32, %c0_i32_0 : i32, i32
  }
  func.func @transform_7(%arg0: i32) -> (i32, i32) {
    %c0_i32 = arith.constant 0 : i32
    %c0_i32_0 = arith.constant 0 : i32
    return %arg0, %c0_i32 : i32, i32
  }
}

</mosaic_0001>

<bundles_post_ra>
// kernel: fused_mlp_forward.1
= control target key start
LH: loop header
LB: loop body
LE: loop exit
PB: predicated region body
PF: predicated region fallthrough
CT: control target
= control target key end

     0   :  { %12 = vsyncpa [#allocation3], 0  ;;  %s430_s0 = inlined_call_operand.vmem [shape: f32[8,128], index: 0, kind: input, shape index: {}]   ;;  %s431_s1 = inlined_call_operand.hbm [shape: f32[128,128], index: 1, kind: input, shape index: {}]   ;;  %s432_s2 = inlined_call_operand.vmem [shape: f32[1,128], index: 2, kind: input, shape index: {}]   ;;  %s433_s3 = inlined_call_operand.hbm [shape: f32[128,128], index: 3, kind: input, shape index: {}]   ;;  %s434_s4 = inlined_call_operand.vmem [shape: f32[1,128], index: 4, kind: input, shape index: {}]   ;;  %s435_s5 = inlined_call_operand.hbm [shape: f32[128,128], index: 5, kind: input, shape index: {}]   ;;  %s436_s6 = inlined_call_operand.vmem [shape: f32[1,128], index: 6, kind: input, shape index: {}]   ;;  %s437_s7 = inlined_call_operand.hbm [shape: f32[8,128], index: 7, kind: output, shape index: {}]  }
   0x1   :  { %13 = vsyncpa [#allocation6], 0 }
   0x2   :  { %14 = vsyncpa [#allocation4], 0  ;;  %s36_s26 = sshll.u32 %s433_s3, 4  ;;  %s360_s27 = smov [#allocation5]   ;;  %s37_s26 = int_to_ptr.hbm [resolvable:$true] %s36_s26 }
   0x3   :  { %s38_s28 = sshll.u32 %s360_s27, 4  ;;  %s21_s8 = sshll.u32 %s431_s1, 4  ;;  %s39_s28 = int_to_ptr.vmem [resolvable:$true] %s38_s28  ;;  %s22_s8 = int_to_ptr.hbm [resolvable:$true] %s21_s8 }
   0x4   :  { %s361_s9 = smov 128   ;;  %s362_s10 = smov 8  }
   0x5   :  { %44 = dma.hbm_to_vmem [thread:$0]  %s37_s26, 2048, %s39_s28, [#allocation6], %s361_s9, %s361_s9, %s362_s10  }
   0x6   :  { %s363_s11 = smov [#allocation2]   ;;  %s51_s15 = sshll.u32 %s435_s5, 4  ;;  %s52_s15 = int_to_ptr.hbm [resolvable:$true] %s51_s15 }
   0x7   :  { %s23_s12 = sshll.u32 %s363_s11, 4  ;;  %s364_s3 = smov [#allocation7]   ;;  %s24_s12 = int_to_ptr.vmem [resolvable:$true] %s23_s12 }
   0x8   :  { %29 = dma.hbm_to_vmem [thread:$0]  %s22_s8, 2048, %s24_s12, [#allocation3], %s361_s9, %s361_s9, %s362_s10  }
   0x9   :  { %s53_s16 = sshll.u32 %s364_s3, 4  ;;  %s54_s16 = int_to_ptr.vmem [resolvable:$true] %s53_s16 }
   0xa   :  { %59 = dma.hbm_to_vmem [thread:$0]  %s52_s15, 2048, %s54_s16, [#allocation6], %s361_s9, %s361_s9, %s362_s10  }
   0xb   :  { %354 = dma.done.wait [#allocation3], 2048  }
   0xc   :  { %355 = vsyncadd [#allocation3], 4294965248 }
   0xd   :  { %356 = dma.done.wait [#allocation6], 4096  }
   0xe   :  { %357 = vsyncadd [#allocation6], 4294963200  ;;  %v90_v0 = vld [vmem:[#allocation2 + $0x78] sm:$0xff]  ;;  %v89_v1 = vld [vmem:[#allocation2 + $0x70] sm:$0xff]  ;;  %v199_v59 = vlaneseq  ;;  %s234_s23 = sshll.u32 %s437_s7, 4  ;;  %s235_s23 = int_to_ptr.hbm [resolvable:$true] %s234_s23 }
   0xf   :  { %95 = vmatpush.msra.mxu0 %v90_v0  ;;  %v88_v2 = vld [vmem:[#allocation2 + $0x68] sm:$0xff]  ;;  %v87_v3 = vld [vmem:[#allocation2 + $0x60] sm:$0xff]  ;;  %v132_v4 = vld [vmem:[#allocation5 + $0x78] sm:$0xff] }
  0x10   :  { %v86_v5 = vld [vmem:[#allocation2 + $0x58] sm:$0xff]  ;;  %137 = vmatpush.msra.mxu1 %v132_v4  ;;  %v131_v6 = vld [vmem:[#allocation5 + $0x70] sm:$0xff]  ;;  %v130_v7 = vld [vmem:[#allocation5 + $0x68] sm:$0xff]  ;;  %v200_v60 = vand.u32 127, %v199_v59 }
  0x11   :  { %96 = vmatpush.msra.mxu0 %v89_v1  ;;  %v85_v8 = vld [vmem:[#allocation2 + $0x50] sm:$0xff]  ;;  %v129_v9 = vld [vmem:[#allocation5 + $0x60] sm:$0xff]  ;;  %v84_v10 = vld [vmem:[#allocation2 + $0x48] sm:$0xff] }
  0x12   :  { %138 = vmatpush.msra.mxu1 %v131_v6  ;;  %v128_v11 = vld [vmem:[#allocation5 + $0x58] sm:$0xff]  ;;  %v83_v12 = vld [vmem:[#allocation2 + $0x40] sm:$0xff]  ;;  %v127_v13 = vld [vmem:[#allocation5 + $0x50] sm:$0xff]  ;;  %vm201_vm0 = vcmp.lt.s32.totalorder %v200_v60, 16 }
  0x13   :  { %97 = vmatpush.msra.mxu0 %v88_v2  ;;  %v82_v14 = vld [vmem:[#allocation2 + $0x38] sm:$0xff]  ;;  %v126_v15 = vld [vmem:[#allocation5 + $0x48] sm:$0xff]  ;;  %v81_v16 = vld [vmem:[#allocation2 + $0x30] sm:$0xff] }
  0x14   :  { %139 = vmatpush.msra.mxu1 %v130_v7  ;;  %v125_v17 = vld [vmem:[#allocation5 + $0x40] sm:$0xff]  ;;  %v80_v18 = vld [vmem:[#allocation2 + $0x28] sm:$0xff]  ;;  %v124_v19 = vld [vmem:[#allocation5 + $0x38] sm:$0xff] }
  0x15   :  { %98 = vmatpush.msra.mxu0 %v87_v3  ;;  %v79_v20 = vld [vmem:[#allocation2 + $0x20] sm:$0xff]  ;;  %v123_v21 = vld [vmem:[#allocation5 + $0x30] sm:$0xff]  ;;  %v78_v22 = vld [vmem:[#allocation2 + $0x18] sm:$0xff] }
  0x16   :  { %140 = vmatpush.msra.mxu1 %v129_v9  ;;  %v122_v23 = vld [vmem:[#allocation5 + $0x28] sm:$0xff]  ;;  %v77_v24 = vld [vmem:[#allocation2 + $0x10] sm:$0xff]  ;;  %v121_v25 = vld [vmem:[#allocation5 + $0x20] sm:$0xff] }
  0x17   :  { %99 = vmatpush.msra.mxu0 %v86_v5  ;;  %v76_v26 = vld [vmem:[#allocation2 + $0x8] sm:$0xff]  ;;  %v75_v27 = vld [vmem:[#allocation2] sm:$0xff]  ;;  %v120_v29 = vld [vmem:[#allocation5 + $0x18] sm:$0xff] }
  0x18   :  { %141 = vmatpush.msra.mxu1 %v128_v11  ;;  %v74_v28 = vld [vmem:[%s430_s0] sm:$0xff]  ;;  %v119_v30 = vld [vmem:[#allocation5 + $0x10] sm:$0xff]  ;;  %v118_v31 = vld [vmem:[#allocation5 + $0x8] sm:$0xff] }
  0x19   :  { %100 = vmatpush.msra.mxu0 %v85_v8  ;;  %v117_v32 = vld [vmem:[#allocation5] sm:$0xff]  ;;  %v174_v33 = vld [vmem:[#allocation7 + $0x78] sm:$0xff]  ;;  %v173_v34 = vld [vmem:[#allocation7 + $0x70] sm:$0xff] }
  0x1a   :  { %142 = vmatpush.msra.mxu1 %v127_v13  ;;  %179 = vmatpush.msra.mxu2 %v174_v33  ;;  %v172_v35 = vld [vmem:[#allocation7 + $0x68] sm:$0xff]  ;;  %v171_v36 = vld [vmem:[#allocation7 + $0x60] sm:$0xff]  ;;  %v170_v37 = vld [vmem:[#allocation7 + $0x58] sm:$0xff] }
  0x1b   :  { %101 = vmatpush.msra.mxu0 %v84_v10  ;;  %v169_v38 = vld [vmem:[#allocation7 + $0x50] sm:$0xff]  ;;  %v168_v39 = vld [vmem:[#allocation7 + $0x48] sm:$0xff]  ;;  %v167_v40 = vld [vmem:[#allocation7 + $0x40] sm:$0xff] }
  0x1c   :  { %143 = vmatpush.msra.mxu1 %v126_v15  ;;  %180 = vmatpush.msra.mxu2 %v173_v34  ;;  %v166_v41 = vld [vmem:[#allocation7 + $0x38] sm:$0xff]  ;;  %v165_v42 = vld [vmem:[#allocation7 + $0x30] sm:$0xff]  ;;  %v164_v43 = vld [vmem:[#allocation7 + $0x28] sm:$0xff] }
  0x1d   :  { %102 = vmatpush.msra.mxu0 %v83_v12  ;;  %v163_v44 = vld [vmem:[#allocation7 + $0x20] sm:$0xff]  ;;  %v162_v50 = vld [vmem:[#allocation7 + $0x18] sm:$0xff]  ;;  %v161_v51 = vld [vmem:[#allocation7 + $0x10] sm:$0xff] }
  0x1e   :  { %144 = vmatpush.msra.mxu1 %v125_v17  ;;  %181 = vmatpush.msra.mxu2 %v172_v35  ;;  %v251_v45 = vld [vmem:[%s432_s2] ss:$0 sm:$0xff]  ;;  %v160_v52 = vld [vmem:[#allocation7 + $0x8] sm:$0xff] }
  0x1f   :  { %103 = vmatpush.msra.mxu0 %v82_v14  ;;  %v159_v53 = vld [vmem:[#allocation7] sm:$0xff] }
  0x20   :  { %145 = vmatpush.msra.mxu1 %v124_v19  ;;  %182 = vmatpush.msra.mxu2 %v171_v36  ;;  %v252_v54 = vld [vmem:[%s434_s4] ss:$0 sm:$0xff]  ;;  %s365_s4 = smov [#allocation8]  }
  0x21   :  { %104 = vmatpush.msra.mxu0 %v81_v16  ;;  %v253_v61 = vld [vmem:[%s436_s6] ss:$0 sm:$0xff]  ;;  %s232_s6 = sshll.u32 %s365_s4, 4  ;;  %s233_s6 = int_to_ptr.vmem [resolvable:$true] %s232_s6 }
  0x22   :  { %146 = vmatpush.msra.mxu1 %v123_v21  ;;  %183 = vmatpush.msra.mxu2 %v170_v37 }
  0x23   :  { %105 = vmatpush.msra.mxu0 %v80_v18 }
  0x24   :  { %147 = vmatpush.msra.mxu1 %v122_v23  ;;  %184 = vmatpush.msra.mxu2 %v169_v38 }
  0x25   :  { %106 = vmatpush.msra.mxu0 %v79_v20 }
  0x26   :  { %148 = vmatpush.msra.mxu1 %v121_v25  ;;  %185 = vmatpush.msra.mxu2 %v168_v39 }
  0x27   :  { %107 = vmatpush.msra.mxu0 %v78_v22 }
  0x28   :  { %149 = vmatpush.msra.mxu1 %v120_v29  ;;  %186 = vmatpush.msra.mxu2 %v167_v40 }
  0x29   :  { %108 = vmatpush.msra.mxu0 %v77_v24 }
  0x2a   :  { %150 = vmatpush.msra.mxu1 %v119_v30  ;;  %187 = vmatpush.msra.mxu2 %v166_v41 }
  0x2b   :  { %109 = vmatpush.msra.mxu0 %v76_v26 }
  0x2c   :  { %151 = vmatpush.msra.mxu1 %v118_v31  ;;  %188 = vmatpush.msra.mxu2 %v165_v42 }
  0x2d   :  { %110 = vmatpush.msra.mxu0 %v75_v27 }
  0x2e   :  { %111 = vmatmul.f32.vlgmr.msra.gmra.mxu0 %v74_v28  ;;  %152 = vmatpush.msra.mxu1 %v117_v32 }
  0x2f   :  { %189 = vmatpush.msra.mxu2 %v164_v43 }
  0x31   :  { %190 = vmatpush.msra.mxu2 %v163_v44 }
  0x33   :  { %191 = vmatpush.msra.mxu2 %v162_v50 }
  0x35   :  { %192 = vmatpush.msra.mxu2 %v161_v51 }
  0x37   :  { %193 = vmatpush.msra.mxu2 %v160_v52 }
  0x39   :  { %194 = vmatpush.msra.mxu2 %v159_v53 }
  0xab   :  { %v112_v46 = vpop.f32.mrf.mxu0 }
  0xac   :  { %v113_v47 = vadd.f32 %v251_v45, %v112_v46 }
  0xae   :  { %v115_v48 = vmul.f32 0.2, %v113_v47 }
  0xb0   :  { %v116_v49 = vmax.f32 %v113_v47, %v115_v48 }
  0xb2   :  { %153 = vmatmul.f32.vlgmr.msra.gmra.mxu1 %v116_v49 }
 0x12f   :  { %v154_v55 = vpop.f32.mrf.mxu1 }
 0x130   :  { %v155_v56 = vadd.f32 %v252_v54, %v154_v55 }
 0x132   :  { %v157_v57 = vmul.f32 0.2, %v155_v56 }
 0x134   :  { %v158_v58 = vmax.f32 %v155_v56, %v157_v57 }
 0x136   :  { %195 = vmatmul.f32.vlgmr.msra.gmra.mxu2 %v158_v58 }
 0x1b9   :  { %v196_v62 = vpop.f32.mrf.mxu2 }
 0x1ba   :  { %v197_v63 = vadd.f32 %v253_v61, %v196_v62 }
 0x1bc   :  { %v202_v0 = vsel %vm201_vm0, %v197_v63, -1e+30 }
 0x1bd   :  { %203 = vmax.xlane.f32.xlu0 %v202_v0 }
 0x230   :  { %v204_v1 = vpop.xlane.xlu0 %203 }
 0x231   :  { %v205_v2 = vsub.f32 %v202_v0, %v204_v1 }
 0x233   :  { %v206_v3 = vmul.f32 1.442695, %v205_v2 }
 0x235   :  { %254 = vpow2.f32 %v206_v3 }
 0x23b   :  { %v255_v4 = vpop.eup %254 }
 0x23c   :  { %208 = vadd.xlane.f32.xlu0 %v255_v4 }
 0x2af   :  { %v209_v5 = vpop.xlane.xlu0 %208 }
 0x2b0   :  { %256 = vrcp.f32 %v209_v5  ;;  %v221_v9 = vand.u32 2147483648, %v209_v5  ;;  %v219_v11 = vand.u32 2147483647, %v209_v5  ;;  %vm215_vm2 = vweird.f32 %v209_v5 }
 0x2b2   :  { %v222_v13 = vor.u32 1.1754944e-38, %v221_v9  ;;  %vm220_vm4 = vcmp.eq.f32.partialorder %v219_v11, 8.507059e+37 }
 0x2b6   :  { %v257_v6 = vpop.eup %256 }
 0x2b7   :  { %v211_v7 = vmul.f32 %v257_v6, %v209_v5  ;;  %vm216_vm1 = vweird.f32 %v257_v6 }
 0x2b8   :  { %vm217_vm3 = vmor %vm215_vm2, %vm216_vm1 }
 0x2b9   :  { %v212_v8 = vsub.f32 1.0, %v211_v7 }
 0x2bb   :  { %v213_v10 = vmul.f32 %v257_v6, %v212_v8 }
 0x2bd   :  { %v214_v12 = vadd.f32 %v257_v6, %v213_v10 }
 0x2bf   :  { %v218_v14 = vsel %vm217_vm3, %v257_v6, %v214_v12 }
 0x2c0   :  { %v223_v15 = vsel %vm220_vm4, %v222_v13, %v218_v14 }
 0x2c1   :  { %v225_v16 = vmul.f32 %v255_v4, %v223_v15 }
 0x2c3   :  { %226 = vst [vmem:[#allocation8] sm:$0xff] %v225_v16 }
 0x2c4   :  { %237 = dma.vmem_to_hbm [thread:$0]  %s233_s6, 128, %s235_s23, [#allocation4]  }
 0x2c5   :  { %358 = dma.done.wait [#allocation4], 128  }
 0x2c6   :  { %359 = vsyncadd [#allocation4], 4294967168 }
 0x2c7   :  { %242 = vsyncpa [#allocation3], 1 }
 0x2c8   :  { %243 = vsyncpa [#allocation6], 1 }
 0x2c9   :  { %244 = vsyncpa [#allocation4], 1 }

</bundles_post_ra>
